<compile_context>
chip_gen: v6e
topology: v6e:2x2x1
jax: 0.10.0
libtpu: 0.0.40
codegen_flags: <defaults>
</compile_context>

<pallas_src>
import functools

import jax
import jax.numpy as jnp
from jax import lax
from jax.experimental import pallas as pl
from jax.experimental.pallas import tpu as pltpu


def _convnet_kernel(x_ref, w1_ref, w2_ref, w3_ref, b1_ref, b2_ref, b3_ref,
                    o_ref, p1_ref, y1_ref, p2_ref, y2_ref, p3_ref,
                    *, nb, length, taps, pads):
    """One batch tile of nb samples, rows = nb*length, channels on lanes."""

    def fill_patches(act, patch_ref, l, k_taps, pad):
        # im2col: patch[:, k*cin:(k+1)*cin] = act shifted by (k - pad) rows,
        # zeroed where the shift crosses a sample boundary ('same' padding).
        rows, cin = act.shape
        pos = lax.rem(lax.broadcasted_iota(jnp.int32, (rows, 1), 0), l)
        for k in range(k_taps):                      # K stores, whole tile each
            d = k - pad
            shifted = act if d == 0 else pltpu.roll(act, shift=(-d) % rows, axis=0)
            valid = jnp.logical_and(pos >= -d, pos <= (l - 1) - d)
            patch_ref[:, k * cin:(k + 1) * cin] = jnp.where(
                valid, shifted, 0.0).astype(patch_ref.dtype)

    def conv_relu(act, patch_ref, w_ref, b_ref, l, k_taps, pad):
        fill_patches(act, patch_ref, l, k_taps, pad)
        y = jnp.dot(patch_ref[...], w_ref[...],
                    preferred_element_type=jnp.float32)       # one MXU matmul
        return jnp.maximum(y + b_ref[...], 0.0)               # f32 elementwise

    def max_pool2(y, y_ref):
        # floor-mode MaxPool1d(2): pooled[q] = max(y[2q], y[2q+1]) per sample.
        # Per-sample lengths are even here, so the pairing holds on the
        # flattened (batch*length) row axis; use stride-2 sublane loads.
        y_ref[...] = y
        half = y_ref.shape[0] // 2
        even = y_ref[pl.ds(0, half, stride=2), :]
        odd = y_ref[pl.ds(1, half, stride=2), :]
        return jnp.maximum(even, odd)

    l1, l2, l3 = length, length // 2, length // 4

    a = x_ref[...]                                                   # (nb*l1, 6)
    a = max_pool2(conv_relu(a, p1_ref, w1_ref, b1_ref, l1, taps[0], pads[0]),
                  y1_ref)                                            # (nb*l2, 32)
    a = max_pool2(conv_relu(a, p2_ref, w2_ref, b2_ref, l2, taps[1], pads[1]),
                  y2_ref)                                            # (nb*l3, 64)
    a = conv_relu(a, p3_ref, w3_ref, b3_ref, l3, taps[2], pads[2])   # (nb*l3,128)
    o_ref[...] = a.astype(o_ref.dtype)


def _as_mat(w, dtype):
    # (cout, cin, k) -> (k*cin, cout):  W[k*cin + ci, co] = w[co, ci, k]
    return jnp.transpose(w, (2, 1, 0)).reshape(-1, w.shape[0]).astype(dtype)


@functools.partial(jax.jit, static_argnames=("mxu_dtype", "block_batch"))
def convnet_forward(x, params, *, mxu_dtype=jnp.bfloat16, block_batch=None):
    """x: (N, 6, L) f32; params: ((w1,b1),(w2,b2),(w3,b3)) in PyTorch layout."""
    (w1, b1), (w2, b2), (w3, b3) = params
    N, cin, L = x.shape
    assert L % 4 == 0, "fast pooling path needs L % 4 == 0"
    # TODO(synk): lengths not divisible by 4 need per-sample floor-mode pooling.
    L1, L2, L3 = L, L // 2, L // 4
    couts = (w1.shape[0], w2.shape[0], w3.shape[0])          # 32, 64, 128
    taps = (w1.shape[2], w2.shape[2], w3.shape[2])           # 5, 3, 3
    pads = tuple(k // 2 for k in taps)                       # 2, 1, 1 ('same')
    cins = (cin, couts[0], couts[1])

    if block_batch is None:
        # Target ~256 matmul rows at the last layer per tile (fills the MXU
        # M-dim on v6e/v7x) while keeping per-tile VMEM small; pick a divisor.
        want = max(1, min(N, 256 // max(L3, 1)))
        block_batch = next(nbv for nbv in range(want, 0, -1) if N % nbv == 0)
    nb = block_batch
    assert N % nb == 0

    # Host-side layout plumbing (folds under jit): channels-last rows and
    # im2col weight matrices; biases as (1, cout) rows.
    x_rows = jnp.transpose(x, (0, 2, 1)).reshape(N * L1, cin)
    w_mats = [_as_mat(w, mxu_dtype) for w in (w1, w2, w3)]
    b_rows = [b.reshape(1, -1).astype(jnp.float32) for b in (b1, b2, b3)]
    operands = (x_rows, *w_mats, *b_rows)

    batch_spec = lambda i: (i, 0)      # tile over batch rows
    const_spec = lambda i: (0, 0)      # weights / biases stay resident

    in_specs = [
        pl.BlockSpec((nb * L1, cin), batch_spec),
        pl.BlockSpec(w_mats[0].shape, const_spec),
        pl.BlockSpec(w_mats[1].shape, const_spec),
        pl.BlockSpec(w_mats[2].shape, const_spec),
        pl.BlockSpec(b_rows[0].shape, const_spec),
        pl.BlockSpec(b_rows[1].shape, const_spec),
        pl.BlockSpec(b_rows[2].shape, const_spec),
    ]
    out_specs = pl.BlockSpec((nb * L3, couts[2]), batch_spec)

    scratch_shapes = [
        pltpu.VMEM((nb * L1, taps[0] * cins[0]), mxu_dtype),   # im2col patches 1
        pltpu.VMEM((nb * L1, couts[0]), jnp.float32),          # conv1 output
        pltpu.VMEM((nb * L2, taps[1] * cins[1]), mxu_dtype),   # im2col patches 2
        pltpu.VMEM((nb * L2, couts[1]), jnp.float32),          # conv2 output
        pltpu.VMEM((nb * L3, taps[2] * cins[2]), mxu_dtype),   # im2col patches 3
    ]

    flops = sum(2 * (N * l) * (k * ci) * co
                for l, k, ci, co in zip((L1, L2, L3), taps, cins, couts))
    bytes_accessed = sum(op.size * op.dtype.itemsize for op in operands)
    bytes_accessed += N * L3 * couts[2] * 4

    kernel = functools.partial(_convnet_kernel, nb=nb, length=L1,
                               taps=taps, pads=pads)

    out_rows = pl.pallas_call(
        kernel,
        out_shape=jax.ShapeDtypeStruct((N * L3, couts[2]), jnp.float32),
        grid=(N // nb,),
        in_specs=in_specs,
        out_specs=out_specs,
        scratch_shapes=scratch_shapes,
        compiler_params=pltpu.CompilerParams(
            dimension_semantics=("parallel",),        # batch tiles → both TCs on v7x
            vmem_limit_bytes=32 * 1024 * 1024),
        cost_estimate=pl.CostEstimate(flops=int(flops), transcendentals=0,
                                      bytes_accessed=int(bytes_accessed)),
    )(*operands)

    # Layout plumbing back to PyTorch NCL: (N*L3, 128) -> (N, 128, L3).
    return out_rows.reshape(N, L3, couts[2]).transpose(0, 2, 1)


def init_conv_params(key, cout, cin, k):
    # PyTorch-style uniform init: U(-1/sqrt(cin*k), 1/sqrt(cin*k)).
    kw, kb = jax.random.split(key)
    bound = 1.0 / jnp.sqrt(cin * k)
    w = jax.random.uniform(kw, (cout, cin, k), jnp.float32, -bound, bound)
    b = jax.random.uniform(kb, (cout,), jnp.float32, -bound, bound)
    return w, b


def convnet_reference(x, params):
    # Pure-JAX/XLA reference for the numerical check.
    def conv(x, w, b, pad):
        y = lax.conv_general_dilated(
            x, w, window_strides=(1,), padding=[(pad, pad)],
            dimension_numbers=("NCH", "OIH", "NCH"))
        return jax.nn.relu(y + b[None, :, None])

    def pool(x):
        n, c, l = x.shape
        l2 = (l // 2) * 2
        return jnp.max(x[:, :, :l2].reshape(n, c, l2 // 2, 2), axis=-1)

    (w1, b1), (w2, b2), (w3, b3) = params
    x = pool(conv(x, w1, b1, 2))
    x = pool(conv(x, w2, b2, 1))
    return conv(x, w3, b3, 1)


if __name__ == "__main__":
    key = jax.random.PRNGKey(0)
    kx, k1, k2, k3 = jax.random.split(key, 4)

    N, Cin, L = 4, 6, 16
    x = jax.random.normal(kx, (N, Cin, L), jnp.float32)
    params = (
        init_conv_params(k1, 32, 6, 5),
        init_conv_params(k2, 64, 32, 3),
        init_conv_params(k3, 128, 64, 3),
    )

    ref = convnet_reference(x, params)

    # f32 MXU operands for a tight numerical check; block_batch=2 exercises the
    # multi-step batch grid (grid=(2,)) and tile-boundary correctness.
    out_f32 = jax.block_until_ready(
        convnet_forward(x, params, mxu_dtype=jnp.float32, block_batch=2))
    assert out_f32.shape == (N, 128, L // 4), out_f32.shape
    assert jnp.allclose(out_f32, ref, atol=1e-4, rtol=1e-4), "mismatch (f32 path)"

    # Default path: bf16 MXU operands, f32 accumulation/elementwise — loose check.
    out_bf16 = jax.block_until_ready(convnet_forward(x, params))
    assert out_bf16.shape == (N, 128, L // 4), out_bf16.shape
    assert jnp.allclose(out_bf16, ref, atol=2e-1, rtol=2e-1), "mismatch (bf16 path)"

    print("KERNEL_OK")
</pallas_src>

<mosaic_0001>
module attributes {stable_mosaic.version = 11 : i64} {
  func.func @_convnet_kernel(%arg0: i32, %arg1: memref<32x6xf32, #tpu.memory_space<vmem>>, %arg2: memref<30x32xf32, #tpu.memory_space<vmem>>, %arg3: memref<96x64xf32, #tpu.memory_space<vmem>>, %arg4: memref<192x128xf32, #tpu.memory_space<vmem>>, %arg5: memref<1x32xf32, #tpu.memory_space<vmem>>, %arg6: memref<1x64xf32, #tpu.memory_space<vmem>>, %arg7: memref<1x128xf32, #tpu.memory_space<vmem>>, %arg8: memref<8x128xf32, #tpu.memory_space<vmem>>, %arg9: memref<32x30xf32, #tpu.memory_space<vmem>>, %arg10: memref<32x32xf32, #tpu.memory_space<vmem>>, %arg11: memref<16x96xf32, #tpu.memory_space<vmem>>, %arg12: memref<16x64xf32, #tpu.memory_space<vmem>>, %arg13: memref<8x192xf32, #tpu.memory_space<vmem>>) attributes {dimension_semantics = [#tpu.dimension_semantics<parallel>], iteration_bounds = array<i64: 2>, scalar_prefetch = 0 : i64, scratch_operands = 5 : i64, tpu.core_type = #tpu.core_type<tc>, window_params = [{transform_indices = @transform_0, window_bounds = array<i64: 32, 6>}, {pipeline_mode = #tpu.pipeline_mode<synchronous>, transform_indices = @transform_1, window_bounds = array<i64: 30, 32>}, {pipeline_mode = #tpu.pipeline_mode<synchronous>, transform_indices = @transform_2, window_bounds = array<i64: 96, 64>}, {pipeline_mode = #tpu.pipeline_mode<synchronous>, transform_indices = @transform_3, window_bounds = array<i64: 192, 128>}, {pipeline_mode = #tpu.pipeline_mode<synchronous>, transform_indices = @transform_4, window_bounds = array<i64: 1, 32>}, {pipeline_mode = #tpu.pipeline_mode<synchronous>, transform_indices = @transform_5, window_bounds = array<i64: 1, 64>}, {pipeline_mode = #tpu.pipeline_mode<synchronous>, transform_indices = @transform_6, window_bounds = array<i64: 1, 128>}, {transform_indices = @transform_7, window_bounds = array<i64: 8, 128>}]} {
    %c0 = arith.constant 0 : index
    %c0_0 = arith.constant 0 : index
    %0 = vector.load %arg1[%c0, %c0_0] : memref<32x6xf32, #tpu.memory_space<vmem>>, vector<32x6xf32>
    %1 = tpu.iota {dimensions = array<i32: 0>} : vector<32x1xi32>
    %c16_i32 = arith.constant 16 : i32
    %2 = vector.broadcast %c16_i32 : i32 to vector<32x1xi32>
    %3 = arith.remsi %1, %2 : vector<32x1xi32>
    %c2_i32 = arith.constant 2 : i32
    %4 = tpu.dynamic_rotate %0 by %c2_i32 dim 0 : vector<32x6xf32>, i32 -> vector<32x6xf32>
    %c2_i32_1 = arith.constant 2 : i32
    %5 = vector.broadcast %c2_i32_1 : i32 to vector<32x1xi32>
    %6 = arith.cmpi sge, %3, %5 : vector<32x1xi32>
    %c17_i32 = arith.constant 17 : i32
    %7 = vector.broadcast %c17_i32 : i32 to vector<32x1xi32>
    %8 = arith.cmpi sle, %3, %7 : vector<32x1xi32>
    %9 = arith.andi %6, %8 : vector<32x1xi1>
    %cst = arith.constant 0.000000e+00 : f32
    %10 = vector.shape_cast %9 : vector<32x1xi1> to vector<32x1xi1>
    %11 = vector.broadcast %10 : vector<32x1xi1> to vector<32x6xi1>
    %12 = vector.broadcast %cst : f32 to vector<32x6xf32>
    %13 = arith.select %11, %4, %12 : vector<32x6xi1>, vector<32x6xf32>
    %c0_2 = arith.constant 0 : index
    %c0_3 = arith.constant 0 : index
    %14 = vector.load %arg9[%c0_2, %c0_3] : memref<32x30xf32, #tpu.memory_space<vmem>>, vector<32x6xf32>
    tpu.vector_store %arg9[%c0_2, %c0_3], %13 {strides = array<i32>} : memref<32x30xf32, #tpu.memory_space<vmem>>, vector<32x6xf32>,
    %c1_i32 = arith.constant 1 : i32
    %15 = tpu.dynamic_rotate %0 by %c1_i32 dim 0 : vector<32x6xf32>, i32 -> vector<32x6xf32>
    %c1_i32_4 = arith.constant 1 : i32
    %16 = vector.broadcast %c1_i32_4 : i32 to vector<32x1xi32>
    %17 = arith.cmpi sge, %3, %16 : vector<32x1xi32>
    %c16_i32_5 = arith.constant 16 : i32
    %18 = vector.broadcast %c16_i32_5 : i32 to vector<32x1xi32>
    %19 = arith.cmpi sle, %3, %18 : vector<32x1xi32>
    %20 = arith.andi %17, %19 : vector<32x1xi1>
    %cst_6 = arith.constant 0.000000e+00 : f32
    %21 = vector.shape_cast %20 : vector<32x1xi1> to vector<32x1xi1>
    %22 = vector.broadcast %21 : vector<32x1xi1> to vector<32x6xi1>
    %23 = vector.broadcast %cst_6 : f32 to vector<32x6xf32>
    %24 = arith.select %22, %15, %23 : vector<32x6xi1>, vector<32x6xf32>
    %c0_7 = arith.constant 0 : index
    %c6 = arith.constant 6 : index
    %25 = vector.load %arg9[%c0_7, %c6] : memref<32x30xf32, #tpu.memory_space<vmem>>, vector<32x6xf32>
    tpu.vector_store %arg9[%c0_7, %c6], %24 {strides = array<i32>} : memref<32x30xf32, #tpu.memory_space<vmem>>, vector<32x6xf32>,
    %c0_i32 = arith.constant 0 : i32
    %26 = vector.broadcast %c0_i32 : i32 to vector<32x1xi32>
    %27 = arith.cmpi sge, %3, %26 : vector<32x1xi32>
    %c15_i32 = arith.constant 15 : i32
    %28 = vector.broadcast %c15_i32 : i32 to vector<32x1xi32>
    %29 = arith.cmpi sle, %3, %28 : vector<32x1xi32>
    %30 = arith.andi %27, %29 : vector<32x1xi1>
    %cst_8 = arith.constant 0.000000e+00 : f32
    %31 = vector.shape_cast %30 : vector<32x1xi1> to vector<32x1xi1>
    %32 = vector.broadcast %31 : vector<32x1xi1> to vector<32x6xi1>
    %33 = vector.broadcast %cst_8 : f32 to vector<32x6xf32>
    %34 = arith.select %32, %0, %33 : vector<32x6xi1>, vector<32x6xf32>
    %c0_9 = arith.constant 0 : index
    %c12 = arith.constant 12 : index
    %35 = vector.load %arg9[%c0_9, %c12] : memref<32x30xf32, #tpu.memory_space<vmem>>, vector<32x6xf32>
    tpu.vector_store %arg9[%c0_9, %c12], %34 {strides = array<i32>} : memref<32x30xf32, #tpu.memory_space<vmem>>, vector<32x6xf32>,
    %c31_i32 = arith.constant 31 : i32
    %36 = tpu.dynamic_rotate %0 by %c31_i32 dim 0 : vector<32x6xf32>, i32 -> vector<32x6xf32>
    %c-1_i32 = arith.constant -1 : i32
    %37 = vector.broadcast %c-1_i32 : i32 to vector<32x1xi32>
    %38 = arith.cmpi sge, %3, %37 : vector<32x1xi32>
    %c14_i32 = arith.constant 14 : i32
    %39 = vector.broadcast %c14_i32 : i32 to vector<32x1xi32>
    %40 = arith.cmpi sle, %3, %39 : vector<32x1xi32>
    %41 = arith.andi %38, %40 : vector<32x1xi1>
    %cst_10 = arith.constant 0.000000e+00 : f32
    %42 = vector.shape_cast %41 : vector<32x1xi1> to vector<32x1xi1>
    %43 = vector.broadcast %42 : vector<32x1xi1> to vector<32x6xi1>
    %44 = vector.broadcast %cst_10 : f32 to vector<32x6xf32>
    %45 = arith.select %43, %36, %44 : vector<32x6xi1>, vector<32x6xf32>
    %c0_11 = arith.constant 0 : index
    %c18 = arith.constant 18 : index
    %46 = vector.load %arg9[%c0_11, %c18] : memref<32x30xf32, #tpu.memory_space<vmem>>, vector<32x6xf32>
    tpu.vector_store %arg9[%c0_11, %c18], %45 {strides = array<i32>} : memref<32x30xf32, #tpu.memory_space<vmem>>, vector<32x6xf32>,
    %c30_i32 = arith.constant 30 : i32
    %47 = tpu.dynamic_rotate %0 by %c30_i32 dim 0 : vector<32x6xf32>, i32 -> vector<32x6xf32>
    %c-2_i32 = arith.constant -2 : i32
    %48 = vector.broadcast %c-2_i32 : i32 to vector<32x1xi32>
    %49 = arith.cmpi sge, %3, %48 : vector<32x1xi32>
    %c13_i32 = arith.constant 13 : i32
    %50 = vector.broadcast %c13_i32 : i32 to vector<32x1xi32>
    %51 = arith.cmpi sle, %3, %50 : vector<32x1xi32>
    %52 = arith.andi %49, %51 : vector<32x1xi1>
    %cst_12 = arith.constant 0.000000e+00 : f32
    %53 = vector.shape_cast %52 : vector<32x1xi1> to vector<32x1xi1>
    %54 = vector.broadcast %53 : vector<32x1xi1> to vector<32x6xi1>
    %55 = vector.broadcast %cst_12 : f32 to vector<32x6xf32>
    %56 = arith.select %54, %47, %55 : vector<32x6xi1>, vector<32x6xf32>
    %c0_13 = arith.constant 0 : index
    %c24 = arith.constant 24 : index
    %57 = vector.load %arg9[%c0_13, %c24] : memref<32x30xf32, #tpu.memory_space<vmem>>, vector<32x6xf32>
    tpu.vector_store %arg9[%c0_13, %c24], %56 {strides = array<i32>} : memref<32x30xf32, #tpu.memory_space<vmem>>, vector<32x6xf32>,
    %c0_14 = arith.constant 0 : index
    %c0_15 = arith.constant 0 : index
    %58 = vector.load %arg9[%c0_14, %c0_15] : memref<32x30xf32, #tpu.memory_space<vmem>>, vector<32x30xf32>
    %c0_16 = arith.constant 0 : index
    %c0_17 = arith.constant 0 : index
    %59 = vector.load %arg2[%c0_16, %c0_17] : memref<30x32xf32, #tpu.memory_space<vmem>>, vector<30x32xf32>
    %cst_18 = arith.constant dense<0.000000e+00> : vector<32x32xf32>
    %60 = tpu.matmul %58, %59, %cst_18 {dimension_numbers = #tpu.dot_dimension_numbers<[1], [0], [0], [1], [0, 0, 1, 1], [], []>} : vector<32x30xf32>, vector<30x32xf32>, vector<32x32xf32> -> vector<32x32xf32>
    %c0_19 = arith.constant 0 : index
    %c0_20 = arith.constant 0 : index
    %61 = vector.load %arg5[%c0_19, %c0_20] : memref<1x32xf32, #tpu.memory_space<vmem>>, vector<1x32xf32>
    %62 = vector.broadcast %61 : vector<1x32xf32> to vector<32x32xf32>
    %63 = arith.addf %60, %62 : vector<32x32xf32>
    %cst_21 = arith.constant 0.000000e+00 : f32
    %64 = vector.broadcast %cst_21 : f32 to vector<32x32xf32>
    %65 = arith.maximumf %63, %64 : vector<32x32xf32>
    %c0_22 = arith.constant 0 : index
    %c0_23 = arith.constant 0 : index
    %66 = vector.load %arg10[%c0_22, %c0_23] : memref<32x32xf32, #tpu.memory_space<vmem>>, vector<32x32xf32>
    tpu.vector_store %arg10[%c0_22, %c0_23], %65 {strides = array<i32>} : memref<32x32xf32, #tpu.memory_space<vmem>>, vector<32x32xf32>,
    %c0_24 = arith.constant 0 : index
    %c0_25 = arith.constant 0 : index
    %67 = tpu.strided_load %arg10[%c0_24, %c0_25] {strides = array<i32: 2, 1>} : memref<32x32xf32, #tpu.memory_space<vmem>>, vector<16x32xf32>
    %c1 = arith.constant 1 : index
    %c0_26 = arith.constant 0 : index
    %68 = tpu.strided_load %arg10[%c1, %c0_26] {strides = array<i32: 2, 1>} : memref<32x32xf32, #tpu.memory_space<vmem>>, vector<16x32xf32>
    %69 = arith.maximumf %67, %68 : vector<16x32xf32>
    %70 = tpu.iota {dimensions = array<i32: 0>} : vector<16x1xi32>
    %c8_i32 = arith.constant 8 : i32
    %71 = vector.broadcast %c8_i32 : i32 to vector<16x1xi32>
    %72 = arith.remsi %70, %71 : vector<16x1xi32>
    %c1_i32_27 = arith.constant 1 : i32
    %73 = tpu.dynamic_rotate %69 by %c1_i32_27 dim 0 : vector<16x32xf32>, i32 -> vector<16x32xf32>
    %c1_i32_28 = arith.constant 1 : i32
    %74 = vector.broadcast %c1_i32_28 : i32 to vector<16x1xi32>
    %75 = arith.cmpi sge, %72, %74 : vector<16x1xi32>
    %c8_i32_29 = arith.constant 8 : i32
    %76 = vector.broadcast %c8_i32_29 : i32 to vector<16x1xi32>
    %77 = arith.cmpi sle, %72, %76 : vector<16x1xi32>
    %78 = arith.andi %75, %77 : vector<16x1xi1>
    %cst_30 = arith.constant 0.000000e+00 : f32
    %79 = vector.shape_cast %78 : vector<16x1xi1> to vector<16x1xi1>
    %80 = vector.broadcast %79 : vector<16x1xi1> to vector<16x32xi1>
    %81 = vector.broadcast %cst_30 : f32 to vector<16x32xf32>
    %82 = arith.select %80, %73, %81 : vector<16x32xi1>, vector<16x32xf32>
    %c0_31 = arith.constant 0 : index
    %c0_32 = arith.constant 0 : index
    %83 = vector.load %arg11[%c0_31, %c0_32] : memref<16x96xf32, #tpu.memory_space<vmem>>, vector<16x32xf32>
    tpu.vector_store %arg11[%c0_31, %c0_32], %82 {strides = array<i32>} : memref<16x96xf32, #tpu.memory_space<vmem>>, vector<16x32xf32>,
    %c0_i32_33 = arith.constant 0 : i32
    %84 = vector.broadcast %c0_i32_33 : i32 to vector<16x1xi32>
    %85 = arith.cmpi sge, %72, %84 : vector<16x1xi32>
    %c7_i32 = arith.constant 7 : i32
    %86 = vector.broadcast %c7_i32 : i32 to vector<16x1xi32>
    %87 = arith.cmpi sle, %72, %86 : vector<16x1xi32>
    %88 = arith.andi %85, %87 : vector<16x1xi1>
    %cst_34 = arith.constant 0.000000e+00 : f32
    %89 = vector.shape_cast %88 : vector<16x1xi1> to vector<16x1xi1>
    %90 = vector.broadcast %89 : vector<16x1xi1> to vector<16x32xi1>
    %91 = vector.broadcast %cst_34 : f32 to vector<16x32xf32>
    %92 = arith.select %90, %69, %91 : vector<16x32xi1>, vector<16x32xf32>
    %c0_35 = arith.constant 0 : index
    %c32 = arith.constant 32 : index
    %93 = vector.load %arg11[%c0_35, %c32] : memref<16x96xf32, #tpu.memory_space<vmem>>, vector<16x32xf32>
    tpu.vector_store %arg11[%c0_35, %c32], %92 {strides = array<i32>} : memref<16x96xf32, #tpu.memory_space<vmem>>, vector<16x32xf32>,
    %c15_i32_36 = arith.constant 15 : i32
    %94 = tpu.dynamic_rotate %69 by %c15_i32_36 dim 0 : vector<16x32xf32>, i32 -> vector<16x32xf32>
    %c-1_i32_37 = arith.constant -1 : i32
    %95 = vector.broadcast %c-1_i32_37 : i32 to vector<16x1xi32>
    %96 = arith.cmpi sge, %72, %95 : vector<16x1xi32>
    %c6_i32 = arith.constant 6 : i32
    %97 = vector.broadcast %c6_i32 : i32 to vector<16x1xi32>
    %98 = arith.cmpi sle, %72, %97 : vector<16x1xi32>
    %99 = arith.andi %96, %98 : vector<16x1xi1>
    %cst_38 = arith.constant 0.000000e+00 : f32
    %100 = vector.shape_cast %99 : vector<16x1xi1> to vector<16x1xi1>
    %101 = vector.broadcast %100 : vector<16x1xi1> to vector<16x32xi1>
    %102 = vector.broadcast %cst_38 : f32 to vector<16x32xf32>
    %103 = arith.select %101, %94, %102 : vector<16x32xi1>, vector<16x32xf32>
    %c0_39 = arith.constant 0 : index
    %c64 = arith.constant 64 : index
    %104 = vector.load %arg11[%c0_39, %c64] : memref<16x96xf32, #tpu.memory_space<vmem>>, vector<16x32xf32>
    tpu.vector_store %arg11[%c0_39, %c64], %103 {strides = array<i32>} : memref<16x96xf32, #tpu.memory_space<vmem>>, vector<16x32xf32>,
    %c0_40 = arith.constant 0 : index
    %c0_41 = arith.constant 0 : index
    %105 = vector.load %arg11[%c0_40, %c0_41] : memref<16x96xf32, #tpu.memory_space<vmem>>, vector<16x96xf32>
    %c0_42 = arith.constant 0 : index
    %c0_43 = arith.constant 0 : index
    %106 = vector.load %arg3[%c0_42, %c0_43] : memref<96x64xf32, #tpu.memory_space<vmem>>, vector<96x64xf32>
    %cst_44 = arith.constant dense<0.000000e+00> : vector<16x64xf32>
    %107 = tpu.matmul %105, %106, %cst_44 {dimension_numbers = #tpu.dot_dimension_numbers<[1], [0], [0], [1], [0, 0, 1, 1], [], []>} : vector<16x96xf32>, vector<96x64xf32>, vector<16x64xf32> -> vector<16x64xf32>
    %c0_45 = arith.constant 0 : index
    %c0_46 = arith.constant 0 : index
    %108 = vector.load %arg6[%c0_45, %c0_46] : memref<1x64xf32, #tpu.memory_space<vmem>>, vector<1x64xf32>
    %109 = vector.broadcast %108 : vector<1x64xf32> to vector<16x64xf32>
    %110 = arith.addf %107, %109 : vector<16x64xf32>
    %cst_47 = arith.constant 0.000000e+00 : f32
    %111 = vector.broadcast %cst_47 : f32 to vector<16x64xf32>
    %112 = arith.maximumf %110, %111 : vector<16x64xf32>
    %c0_48 = arith.constant 0 : index
    %c0_49 = arith.constant 0 : index
    %113 = vector.load %arg12[%c0_48, %c0_49] : memref<16x64xf32, #tpu.memory_space<vmem>>, vector<16x64xf32>
    tpu.vector_store %arg12[%c0_48, %c0_49], %112 {strides = array<i32>} : memref<16x64xf32, #tpu.memory_space<vmem>>, vector<16x64xf32>,
    %c0_50 = arith.constant 0 : index
    %c0_51 = arith.constant 0 : index
    %114 = tpu.strided_load %arg12[%c0_50, %c0_51] {strides = array<i32: 2, 1>} : memref<16x64xf32, #tpu.memory_space<vmem>>, vector<8x64xf32>
    %c1_52 = arith.constant 1 : index
    %c0_53 = arith.constant 0 : index
    %115 = tpu.strided_load %arg12[%c1_52, %c0_53] {strides = array<i32: 2, 1>} : memref<16x64xf32, #tpu.memory_space<vmem>>, vector<8x64xf32>
    %116 = arith.maximumf %114, %115 : vector<8x64xf32>
    %117 = tpu.iota {dimensions = array<i32: 0>} : vector<8x1xi32>
    %c4_i32 = arith.constant 4 : i32
    %118 = vector.broadcast %c4_i32 : i32 to vector<8x1xi32>
    %119 = arith.remsi %117, %118 : vector<8x1xi32>
    %c1_i32_54 = arith.constant 1 : i32
    %120 = tpu.dynamic_rotate %116 by %c1_i32_54 dim 0 : vector<8x64xf32>, i32 -> vector<8x64xf32>
    %c1_i32_55 = arith.constant 1 : i32
    %121 = vector.broadcast %c1_i32_55 : i32 to vector<8x1xi32>
    %122 = arith.cmpi sge, %119, %121 : vector<8x1xi32>
    %c4_i32_56 = arith.constant 4 : i32
    %123 = vector.broadcast %c4_i32_56 : i32 to vector<8x1xi32>
    %124 = arith.cmpi sle, %119, %123 : vector<8x1xi32>
    %125 = arith.andi %122, %124 : vector<8x1xi1>
    %cst_57 = arith.constant 0.000000e+00 : f32
    %126 = vector.shape_cast %125 : vector<8x1xi1> to vector<8x1xi1>
    %127 = vector.broadcast %126 : vector<8x1xi1> to vector<8x64xi1>
    %128 = vector.broadcast %cst_57 : f32 to vector<8x64xf32>
    %129 = arith.select %127, %120, %128 : vector<8x64xi1>, vector<8x64xf32>
    %c0_58 = arith.constant 0 : index
    %c0_59 = arith.constant 0 : index
    %130 = vector.load %arg13[%c0_58, %c0_59] : memref<8x192xf32, #tpu.memory_space<vmem>>, vector<8x64xf32>
    tpu.vector_store %arg13[%c0_58, %c0_59], %129 {strides = array<i32>} : memref<8x192xf32, #tpu.memory_space<vmem>>, vector<8x64xf32>,
    %c0_i32_60 = arith.constant 0 : i32
    %131 = vector.broadcast %c0_i32_60 : i32 to vector<8x1xi32>
    %132 = arith.cmpi sge, %119, %131 : vector<8x1xi32>
    %c3_i32 = arith.constant 3 : i32
    %133 = vector.broadcast %c3_i32 : i32 to vector<8x1xi32>
    %134 = arith.cmpi sle, %119, %133 : vector<8x1xi32>
    %135 = arith.andi %132, %134 : vector<8x1xi1>
    %cst_61 = arith.constant 0.000000e+00 : f32
    %136 = vector.shape_cast %135 : vector<8x1xi1> to vector<8x1xi1>
    %137 = vector.broadcast %136 : vector<8x1xi1> to vector<8x64xi1>
    %138 = vector.broadcast %cst_61 : f32 to vector<8x64xf32>
    %139 = arith.select %137, %116, %138 : vector<8x64xi1>, vector<8x64xf32>
    %c0_62 = arith.constant 0 : index
    %c64_63 = arith.constant 64 : index
    %140 = vector.load %arg13[%c0_62, %c64_63] : memref<8x192xf32, #tpu.memory_space<vmem>>, vector<8x64xf32>
    tpu.vector_store %arg13[%c0_62, %c64_63], %139 {strides = array<i32>} : memref<8x192xf32, #tpu.memory_space<vmem>>, vector<8x64xf32>,
    %c7_i32_64 = arith.constant 7 : i32
    %141 = tpu.dynamic_rotate %116 by %c7_i32_64 dim 0 : vector<8x64xf32>, i32 -> vector<8x64xf32>
    %c-1_i32_65 = arith.constant -1 : i32
    %142 = vector.broadcast %c-1_i32_65 : i32 to vector<8x1xi32>
    %143 = arith.cmpi sge, %119, %142 : vector<8x1xi32>
    %c2_i32_66 = arith.constant 2 : i32
    %144 = vector.broadcast %c2_i32_66 : i32 to vector<8x1xi32>
    %145 = arith.cmpi sle, %119, %144 : vector<8x1xi32>
    %146 = arith.andi %143, %145 : vector<8x1xi1>
    %cst_67 = arith.constant 0.000000e+00 : f32
    %147 = vector.shape_cast %146 : vector<8x1xi1> to vector<8x1xi1>
    %148 = vector.broadcast %147 : vector<8x1xi1> to vector<8x64xi1>
    %149 = vector.broadcast %cst_67 : f32 to vector<8x64xf32>
    %150 = arith.select %148, %141, %149 : vector<8x64xi1>, vector<8x64xf32>
    %c0_68 = arith.constant 0 : index
    %c128 = arith.constant 128 : index
    %151 = vector.load %arg13[%c0_68, %c128] : memref<8x192xf32, #tpu.memory_space<vmem>>, vector<8x64xf32>
    tpu.vector_store %arg13[%c0_68, %c128], %150 {strides = array<i32>} : memref<8x192xf32, #tpu.memory_space<vmem>>, vector<8x64xf32>,
    %c0_69 = arith.constant 0 : index
    %c0_70 = arith.constant 0 : index
    %152 = vector.load %arg13[%c0_69, %c0_70] : memref<8x192xf32, #tpu.memory_space<vmem>>, vector<8x192xf32>
    %c0_71 = arith.constant 0 : index
    %c0_72 = arith.constant 0 : index
    %153 = vector.load %arg4[%c0_71, %c0_72] : memref<192x128xf32, #tpu.memory_space<vmem>>, vector<192x128xf32>
    %cst_73 = arith.constant dense<0.000000e+00> : vector<8x128xf32>
    %154 = tpu.matmul %152, %153, %cst_73 {dimension_numbers = #tpu.dot_dimension_numbers<[1], [0], [0], [1], [0, 0, 1, 1], [], []>} : vector<8x192xf32>, vector<192x128xf32>, vector<8x128xf32> -> vector<8x128xf32>
    %c0_74 = arith.constant 0 : index
    %c0_75 = arith.constant 0 : index
    %155 = vector.load %arg7[%c0_74, %c0_75] : memref<1x128xf32, #tpu.memory_space<vmem>>, vector<1x128xf32>
    %156 = vector.broadcast %155 : vector<1x128xf32> to vector<8x128xf32>
    %157 = arith.addf %154, %156 : vector<8x128xf32>
    %cst_76 = arith.constant 0.000000e+00 : f32
    %158 = vector.broadcast %cst_76 : f32 to vector<8x128xf32>
    %159 = arith.maximumf %157, %158 : vector<8x128xf32>
    %c0_77 = arith.constant 0 : index
    %c0_78 = arith.constant 0 : index
    %160 = vector.load %arg8[%c0_77, %c0_78] : memref<8x128xf32, #tpu.memory_space<vmem>>, vector<8x128xf32>
    tpu.vector_store %arg8[%c0_77, %c0_78], %159 {strides = array<i32>} : memref<8x128xf32, #tpu.memory_space<vmem>>, vector<8x128xf32>,
    return
  }
  func.func @transform_0(%arg0: i32) -> (i32, i32) {
    %c0_i32 = arith.constant 0 : i32
    %c0_i32_0 = arith.constant 0 : i32
    return %arg0, %c0_i32 : i32, i32
  }
  func.func @transform_1(%arg0: i32) -> (i32, i32) {
    %c0_i32 = arith.constant 0 : i32
    %c0_i32_0 = arith.constant 0 : i32
    %c0_i32_1 = arith.constant 0 : i32
    return %c0_i32, %c0_i32_0 : i32, i32
  }
  func.func @transform_2(%arg0: i32) -> (i32, i32) {
    %c0_i32 = arith.constant 0 : i32
    %c0_i32_0 = arith.constant 0 : i32
    %c0_i32_1 = arith.constant 0 : i32
    return %c0_i32, %c0_i32_0 : i32, i32
  }
  func.func @transform_3(%arg0: i32) -> (i32, i32) {
    %c0_i32 = arith.constant 0 : i32
    %c0_i32_0 = arith.constant 0 : i32
    %c0_i32_1 = arith.constant 0 : i32
    return %c0_i32, %c0_i32_0 : i32, i32
  }
  func.func @transform_4(%arg0: i32) -> (i32, i32) {
    %c0_i32 = arith.constant 0 : i32
    %c0_i32_0 = arith.constant 0 : i32
    %c0_i32_1 = arith.constant 0 : i32
    return %c0_i32, %c0_i32_0 : i32, i32
  }
  func.func @transform_5(%arg0: i32) -> (i32, i32) {
    %c0_i32 = arith.constant 0 : i32
    %c0_i32_0 = arith.constant 0 : i32
    %c0_i32_1 = arith.constant 0 : i32
    return %c0_i32, %c0_i32_0 : i32, i32
  }
  func.func @transform_6(%arg0: i32) -> (i32, i32) {
    %c0_i32 = arith.constant 0 : i32
    %c0_i32_0 = arith.constant 0 : i32
    %c0_i32_1 = arith.constant 0 : i32
    return %c0_i32, %c0_i32_0 : i32, i32
  }
  func.func @transform_7(%arg0: i32) -> (i32, i32) {
    %c0_i32 = arith.constant 0 : i32
    %c0_i32_0 = arith.constant 0 : i32
    return %arg0, %c0_i32 : i32, i32
  }
}

</mosaic_0001>

<bundles_post_ra>
// kernel: convnet_forward.1
= control target key start
LH: loop header
LB: loop body
LE: loop exit
PB: predicated region body
PF: predicated region fallthrough
CT: control target
= control target key end

     0   :  { %12 = vsyncpa [#allocation8], 0  ;;  %s1823_s0 = inlined_call_operand.vmem [shape: f32[64,6], index: 0, kind: input, shape index: {}]   ;;  %s1824_s1 = inlined_call_operand.vmem [shape: f32[30,32], index: 1, kind: input, shape index: {}]   ;;  %s1825_s2 = inlined_call_operand.vmem [shape: f32[96,64], index: 2, kind: input, shape index: {}]   ;;  %s1826_s3 = inlined_call_operand.hbm [shape: f32[192,128], index: 3, kind: input, shape index: {}]   ;;  %s1827_s4 = inlined_call_operand.vmem [shape: f32[1,32], index: 4, kind: input, shape index: {}]   ;;  %s1828_s5 = inlined_call_operand.vmem [shape: f32[1,64], index: 5, kind: input, shape index: {}]   ;;  %s1829_s6 = inlined_call_operand.vmem [shape: f32[1,128], index: 6, kind: input, shape index: {}]   ;;  %s1830_s7 = inlined_call_operand.hbm [shape: f32[16,128], index: 7, kind: output, shape index: {}]  }
   0x1   :  { %13 = vsyncpa [#allocation9], 0 }
   0x2   :  { %15 = vsyncpa [#allocation9 + $0x1], 0  ;;  %s1422_s24 = smov 0   ;;  %s1424_s25 = smov 0  }
   0x3   :  { %s1426_s26 = smov 0   ;;  %s1428_s27 = smov 0  }
   0x4 LB: > { %s1443_s28 = sadd.s32 4294967295, %s1369_s27   ;;  %s1133_s29 = sadd.s32 4294967294, %s1369_s27   ;;  %s1369_s27 = sphi %s1428_s27, %s1858_s27   ;;  %s1365_s26 = sphi %s1426_s26, %s1857_s26   ;;  %s1361_s25 = sphi %s1424_s25, %s1856_s25   ;;  %s1357_s24 = sphi %s1422_s24, %s1855_s24  }
   0x5   : > { %s1447_s30 = sadd.s32 1, %s1369_s27   ;;  %s180_s8 = sadd.s32 1, %s1365_s26 }
   0x6   : > { %s177_s9 = ssub.s32 %s1369_s27, %s1447_s30  ;;  %p190_p0 = scmp.ne.s32.totalorder %s1365_s26, %s1361_s25 }
   0x7   : > { %p178_p1 = scmp.eq.s32.totalorder %s177_s9, 0  ;;  %p191_p2 = scmp.eq.s32.totalorder %s1443_s28, 1 }
   0x8   : > { %p196_p3 = scmp.ne.s32.totalorder %s1361_s25, %s1357_s24  ;;  %p197_p4 = scmp.eq.s32.totalorder %s1133_s29, 1 }
   0x9   : > { %s1458_s10 = scalar_select %p178_p1, %s1365_s26, %s180_s8  }
   0xa   : > { %p1460_p5 = por %p191_p2, %p190_p0  ;;  %p1464_p6 = por %p197_p4, %p196_p3 }
   0xb   : > { %p1134_p7 = scmp.ge.s32.totalorder %s1369_s27, 1  ;;  %p204_p8 = scmp.lt.s32.totalorder %s1369_s27, 3 }
   0xc   : > { %s1832_s12 = scalar_select %p1464_p6, 1, 0 }
   0xd   : > { %p1234_p9 = scmp.eq.s32.totalorder %s1443_s28, 0  ;;  %p1471_p10 = pnand %p1134_p7, %p204_p8 }
   0xe   : > { %s1371_s14 = smov [#allocation7]  }
   0xf   : > { %s222_s15 = sshll.u32 %s1371_s14, 4  ;;  %p1226_p11 = pneg %p1471_p10  ;;  %s223_s15 = int_to_ptr.vmem [resolvable:$true] %s222_s15 }
  0x10   : > { %s1290_s16 = scalar_lea.vmem %s223_s15, 3072  ;;  %p1298_p3 = scmp.lt.s32.totalorder %s223_s15, %s223_s15 }
  0x11   : > { %p1227_p12 = pnand %p1234_p9, %p1226_p11  ;;  %p1291_p0 = scmp.ne.s32.totalorder %s223_s15, %s1290_s16 }
  0x12   : > { %p1299_p4 = scmp.lt.s32.totalorder %s1290_s16, %s1290_s16 }
  0x13   : > { %p1281_p13 = pneg %p1227_p12 }
  0x14   : > { %p1300_p6 = por %p1299_p4, %p1298_p3 }
  0x15   : > { %p1293_p1 = pnand %p1291_p0, %p1281_p13 }
  0x17   : > { %p1294_p2 = pneg %p1293_p1 }
  0x19   : > { %p1301_p7 = pnand %p1300_p6, %p1294_p2 }
  0x1b   : > { %1304 = shalt.err (!%p1301_p7)
}
  0x1c   : > { %s1372_s17 = smov 128   ;;  %s1373_s18 = smov 8  }
  0x1d   : > { %1229 = dma.hbm_to_vmem [thread:$0]  (!%p1227_p12), %s1826_s3, 3072, %s223_s15, [#allocation8], %s1372_s17, %s1372_s17, %s1373_s18  }
  0x1e   : > { %256 = sbr.rel (%p1471_p10) target bundleno = 1077 (0x435), region = 48 }
  0x23   : > { %1348 = dma.done.wait (%p1234_p9), [#allocation8], 3072  }
  0x24   : > { %1350 = vsyncadd (%p1234_p9), [#allocation8], 4294964224  ;;  %s1140_s21 = sshll.u32 %s1443_s28, 2  ;;  %v298_v0 = vlaneseq  ;;  %s1374_s9 = smov 12   ;;  %vm364_vm8 = vcmask 48128   ;;  %vm604_vm10 = vcmask 1045504  }
  0x25   : > { %p289_p6 = scmp.lt.s32.totalorder %s1140_s21, 7  ;;  %s1375_s13 = smov 6   ;;  %v583_v43 = vld [vmem:[%s1824_s1 + $0x18] sm:$0x3f]  ;;  %v582_v45 = vld [vmem:[%s1824_s1 + $0x10] sm:$0xff]  ;;  %v581_v51 = vld [vmem:[%s1824_s1 + $0x8] sm:$0xff] }
  0x26   : > { %v1489_v1 = vshrl.u32 %v298_v0, 7  ;;  %s1376_s14 = smov 18   ;;  %s1377_s17 = smov 24   ;;  %1179 = vmatprep.subr.msk.mxu1 %vm604_vm10, %v583_v43  ;;  %v580_v54 = vld [vmem:[%s1824_s1] sm:$0xff]  ;;  %vm418_vm14 = vcmask 97328   ;;  %vm463_vm15 = vcmask 146528  }
  0x27   : > { %s1860_s21 = smov (!%p289_p6, %s1140_s21), 7  ;;  %1180 = vmatpush3.msk.msra.mxu1 %vm604_vm10, %v583_v43  ;;  %v806_v27 = vld [vmem:[%s1825_s2 + $0x58] sm:$0xff]  ;;  %s1378_s29 = smov 32   ;;  %v799_v43 = vld [vmem:[%s1825_s2 + $0x20] sm:$0xff]  ;;  %vm814_vm10 = vcmask 785408  }
  0x28   : > { %v1492_v2 = vadd.s32 8, %v1489_v1  ;;  %s1141_s22 = sshll.u32 %s1860_s21, 3  ;;  %v301_v4 = vadd.s32 16, %v1489_v1  ;;  %vm373_vm0 = vcmp.lt.s32.totalorder %v1489_v1, 1  ;;  %vm472_vm1 = vcmp.lt.s32.totalorder %v1489_v1, 7  ;;  %1181 = vmatprep.subr.mxu1 %v582_v45  ;;  %s1379_s23 = smov 64  }
  0x29   : > { %s292_s8 = scalar_lea.vmem %s1823_s0, %s1141_s22  ;;  %v307_v8 = vand.u32 15, %v1489_v1  ;;  %vm526_vm2 = vcmp.lt.s32.totalorder %v1489_v1, 6  ;;  %vm335_vm3 = vcmp.lt.s32.totalorder %v1489_v1, 2  ;;  %v302_v44 = vadd.s32 24, %v1489_v1  ;;  %1182 = vmatpush3.msra.mxu1 %v582_v45  ;;  %v798_v45 = vld [vmem:[%s1825_s2 + $0x18] sm:$0xff]  ;;  %s1154_s16 = sshll.u32 %s1443_s28, 7 }
  0x2a   : > { %v314_v3 = vand.u32 15, %v1492_v2  ;;  %v1499_v5 = vld [vmem:[%s292_s8] sm:$0xff]  ;;  %v1501_v6 = vld [vmem:[%s292_s8 + $0x8] sm:$0xff]  ;;  %v1505_v7 = vld [vmem:[%s292_s8 + $0x10] sm:$0xff]  ;;  %v321_v19 = vand.u32 15, %v301_v4  ;;  %1183 = vmatprep.subr.mxu1 %v581_v51  ;;  %v715_v49 = vand.u32 7, %v1489_v1  ;;  %s1060_s21 = scalar_lea.hbm %s1830_s7, %s1154_s16 }
  0x2b   : > { %v369_v9 = vrot.slane %v1499_v5, 7  ;;  %v370_v10 = vrot.slane %v1501_v6, 7  ;;  %451 = vrot.lane.b32.xlu1 %v1499_v5, %s1374_s9  ;;  %v468_v11 = vrot.slane %v1499_v5, 1  ;;  %v469_v12 = vrot.slane %v1501_v6, 1  ;;  %v1516_v14 = vld [vmem:[%s292_s8 + $0x18] sm:$0xff]  ;;  %1184 = vmatpush3.msra.mxu1 %v581_v51 }
  0x2c   : > { %v470_v13 = vrot.slane %v1505_v7, 1  ;;  %vm1519_vm4 = vcmp.ge.s32.totalorder %v307_v8, 2  ;;  %vm1527_vm5 = vcmp.le.s32.totalorder %v314_v3, 14  ;;  %v334_v18 = vrot.slane %v1516_v14, 6  ;;  %1185 = vmatprep.subr.mxu1 %v580_v54 }
  0x2d   : > { %v376_v16 = vsel %vm373_vm0, %v369_v9, %v370_v10  ;;  %v522_v20 = vrot.slane %v1499_v5, 2  ;;  %v523_v21 = vrot.slane %v1501_v6, 2  ;;  %v331_v23 = vrot.slane %v1499_v5, 6  ;;  %1186 = vmatpush3.msra.mxu1 %v580_v54 }
  0x2e   : > { %408 = vrot.lane.b32.xlu0 %v376_v16, %s1375_s13  ;;  %v474_v22 = vsel %vm472_vm1, %v469_v12, %v470_v13  ;;  %v475_v24 = vsel %vm472_vm1, %v468_v11, %v469_v12  ;;  %v332_v25 = vrot.slane %v1501_v6, 6  ;;  %v333_v26 = vrot.slane %v1505_v7, 6  ;;  %1193 = vmatprep.subr.mxu1 %v806_v27 }
  0x2f   : > { %453 = vrot.lane.b32.xlu1 %v1501_v6, %s1374_s9  ;;  %vm1548_vm6 = vcmp.ge.s32.totalorder %v321_v19, 2  ;;  %v498_v28 = vsel %vm1527_vm5, %v474_v22, 0.0  ;;  %v372_v29 = vrot.slane %v1516_v14, 7  ;;  %v339_v30 = vsel %vm335_vm3, %v334_v18, %v331_v23 }
  0x30   : > { %v371_v31 = vrot.slane %v1505_v7, 7  ;;  %v360_v32 = vsel %vm1519_vm4, %v339_v30, 0.0  ;;  %v337_v33 = vsel %vm335_vm3, %v332_v25, %v333_v26  ;;  %vm1562_vm7 = vcmp.ge.s32.totalorder %v321_v19, 1  ;;  %v804_v30 = vld [vmem:[%s1825_s2 + $0x48] sm:$0xff] }
  0x31   : > { %v362_v35 = vsel %vm1548_vm6, %v337_v33, 0.0  ;;  %365 = vst.msk [vmem:[#allocation2] sm:$0xff] %vm364_vm8, %v360_v32  ;;  %v529_v37 = vsel %vm526_vm2, %v522_v20, %v523_v21  ;;  %vm1577_vm9 = vcmp.ge.s32.totalorder %v307_v8, 1  ;;  %v377_v39 = vsel %vm373_vm0, %v372_v29, %v369_v9  ;;  %v802_v32 = vld [vmem:[%s1825_s2 + $0x38] sm:$0xff]  ;;  %v801_v33 = vld [vmem:[%s1825_s2 + $0x30] sm:$0xff] }
  0x32   : > { %505 = vrot.lane.b32.xlu0 %v475_v24, %s1376_s14  ;;  %v375_v36 = vsel %vm373_vm0, %v370_v10, %v371_v31  ;;  %367 = vst.msk [vmem:[#allocation2 + $0x10] sm:$0xff] %vm364_vm8, %v362_v35  ;;  %v524_v41 = vrot.slane %v1505_v7, 2  ;;  %v338_v42 = vsel %vm335_vm3, %v331_v23, %v332_v25  ;;  %v398_v46 = vsel %vm1577_vm9, %v377_v39, 0.0 }
  0x33   : > { %507 = vrot.lane.b32.xlu1 %v498_v28, %s1376_s14  ;;  %v400_v40 = vsel %vm1562_vm7, %v375_v36, 0.0  ;;  %366 = vst.msk [vmem:[#allocation2 + $0x8] sm:$0xff] %vm364_vm8, %v338_v42  ;;  %v336_v47 = vsel %vm335_vm3, %v333_v26, %v334_v18  ;;  %vm1607_vm11 = vcmp.le.s32.totalorder %v314_v3, 13  ;;  %v374_v50 = vsel %vm373_vm0, %v371_v31, %v372_v29  ;;  %v805_v28 = vld [vmem:[%s1825_s2 + $0x50] sm:$0xff]  ;;  %v803_v31 = vld [vmem:[%s1825_s2 + $0x40] sm:$0xff]  ;;  %v800_v42 = vld [vmem:[%s1825_s2 + $0x28] sm:$0xff] }
  0x34   : > { %v528_v48 = vsel %vm526_vm2, %v523_v21, %v524_v41  ;;  %368 = vst.msk [vmem:[#allocation2 + $0x18] sm:$0xff] %vm364_vm8, %v336_v47  ;;  %v471_v52 = vrot.slane %v1516_v14, 1  ;;  %v328_v53 = vand.u32 15, %v302_v44  ;;  %v525_v57 = vrot.slane %v1516_v14, 2  ;;  %v1142_v21 = vld [vmem:[%s1827_s4] ss:$0 sm:$0xff] }
  0x35   : > { %v552_v55 = vsel %vm1607_vm11, %v528_v48, 0.0  ;;  %vm517_vm3 = vcmask 195728   ;;  %vm591_vm4 = vcmask 244736   ;;  %vm697_vm5 = vcmask 261120   ;;  %v796_v47 = vld [vmem:[%s1825_s2 + $0x8] sm:$0xff] }
  0x36   : > { %559 = vrot.lane.b32.xlu0 %v529_v37, %s1377_s17  ;;  %v476_v56 = vsel %vm472_vm1, %v471_v52, %v468_v11  ;;  %vm484_vm12 = vcmp.le.s32.totalorder %v328_v53, 14  ;;  %v530_v59 = vsel %vm526_vm2, %v525_v57, %v522_v20  ;;  %vm538_vm13 = vcmp.le.s32.totalorder %v328_v53, 13 }
  0x37   : > { %410 = vrot.lane.b32.xlu1 %v400_v40, %s1375_s13  ;;  %v500_v58 = vsel %vm484_vm12, %v476_v56, 0.0  ;;  %v473_v60 = vsel %vm472_vm1, %v470_v13, %v471_v52  ;;  %v554_v61 = vsel %vm538_vm13, %v530_v59, 0.0  ;;  %v527_v62 = vsel %vm526_vm2, %v524_v41, %v525_v57 }
  0x38   : > { %vm571_vm2 = vcmask 244928   ;;  %v722_v48 = vand.u32 7, %v1492_v2  ;;  %vm1723_vm8 = vcmp.ge.s32.totalorder %v715_v49, 1  ;;  %vm1727_vm9 = vcmp.le.s32.totalorder %v715_v49, 6 }
  0x39   : > { %vm898_vm11 = vcmask 523264  }
  0x3a   : > { %406 = vrot.lane.b32.xlu0 %v398_v46, %s1375_s13  ;;  %v797_v46 = vld [vmem:[%s1825_s2 + $0x10] sm:$0xff]  ;;  %vm1715_vm6 = vcmp.ge.s32.totalorder %v722_v48, 1  ;;  %vm1719_vm7 = vcmp.le.s32.totalorder %v722_v48, 6 }
  0x3b   : > { %412 = vrot.lane.b32.xlu1 %v374_v50, %s1375_s13  ;;  %v795_v50 = vld [vmem:[%s1825_s2] sm:$0xff] }
  0x3e   : > { %561 = vrot.lane.b32.xlu0 %v552_v55, %s1377_s17  ;;  %v1151_v55 = vld [vmem:[%s1829_s6] ss:$0 sm:$0xff] }
  0x3f   : > { %457 = vrot.lane.b32.xlu1 %v1516_v14, %s1374_s9 }
  0x42   : > { %455 = vrot.lane.b32.xlu0 %v1505_v7, %s1374_s9  ;;  %s285_s9 = sand.u32 1, %s1361_s25  }
  0x43   : > { %511 = vrot.lane.b32.xlu1 %v500_v58, %s1376_s14  ;;  %s1139_s13 = sshll.u32 %s285_s9, 3  ;;  %s1049_s22 = scalar_lea.sflag [#allocation9], %s285_s9 }
  0x46   : > { %509 = vrot.lane.b32.xlu0 %v473_v60, %s1376_s14 }
  0x47   : > { %565 = vrot.lane.b32.xlu1 %v554_v61, %s1377_s17 }
  0x4a   : > { %563 = vrot.lane.b32.xlu0 %v527_v62, %s1377_s17  ;;  %s287_s17 = scalar_lea.vmem [#allocation10], %s1139_s13 }
  0x4b   : > { %s1062_s18 = sshll.u32 %s287_s17, 4  ;;  %s1063_s18 = int_to_ptr.vmem [resolvable:$true] %s1062_s18 }
  0x9d   : > { %v452_v63 = vpop.permute.xlu1 %451 }
  0xa0   : > { %v409_v0 = vpop.permute.xlu0 %408 }
  0xa1   : > { %420 = vst.msk [vmem:[#allocation2 + $0x8] sm:$0xff] %vm418_vm14, %v409_v0  ;;  %v454_v3 = vpop.permute.xlu1 %453 }
  0xa2   : > { %465 = vst.msk [vmem:[#allocation2 + $0x8] sm:$0xff] %vm463_vm15, %v454_v3 }
  0xa4   : > { %v506_v4 = vpop.permute.xlu0 %505 }
  0xa5   : > { %v508_v5 = vpop.permute.xlu1 %507 }
  0xa6   : > { %519 = vst.msk [vmem:[#allocation2 + $0x8] sm:$0xff] %vm517_vm3, %v508_v5 }
  0xa8   : > { %v560_v6 = vpop.permute.xlu0 %559 }
  0xa9   : > { %v411_v7 = vpop.permute.xlu1 %410 }
  0xaa   : > { %421 = vst.msk [vmem:[#allocation2 + $0x10] sm:$0xff] %vm418_vm14, %v411_v7 }
  0xac   : > { %v407_v8 = vpop.permute.xlu0 %406 }
  0xad   : > { %419 = vst.msk [vmem:[#allocation2] sm:$0xff] %vm418_vm14, %v407_v8  ;;  %v413_v9 = vpop.permute.xlu1 %412 }
  0xae   : > { %464 = vst.msk [vmem:[#allocation2] sm:$0xff] %vm463_vm15, %v452_v63 }
  0xaf   : > { %422 = vst.msk [vmem:[#allocation2 + $0x18] sm:$0xff] %vm418_vm14, %v413_v9  ;;  %vm930_vm14 = vcmask 1048064  }
  0xb0   : > { %518 = vst.msk [vmem:[#allocation2] sm:$0xff] %vm517_vm3, %v506_v4  ;;  %v562_v10 = vpop.permute.xlu0 %561 }
  0xb1   : > { %572 = vst.msk [vmem:[#allocation2] sm:$0xff] %vm571_vm2, %v560_v6  ;;  %573 = vst.msk [vmem:[#allocation2 + $0x8] sm:$0xff] %vm571_vm2, %v562_v10  ;;  %v458_v11 = vpop.permute.xlu1 %457 }
  0xb2   : > { %467 = vst.msk [vmem:[#allocation2 + $0x18] sm:$0xff] %vm463_vm15, %v458_v11 }
  0xb4   : > { %v456_v12 = vpop.permute.xlu0 %455 }
  0xb5   : > { %466 = vst.msk [vmem:[#allocation2 + $0x10] sm:$0xff] %vm463_vm15, %v456_v12  ;;  %v512_v13 = vpop.permute.xlu1 %511 }
  0xb6   : > { %521 = vst.msk [vmem:[#allocation2 + $0x18] sm:$0xff] %vm517_vm3, %v512_v13  ;;  %v957_v13 = vld [vmem:[#allocation7 + $0x78] sm:$0xff] }
  0xb8   : > { %v576_v14 = vld [vmem:[#allocation2] sm:$0xff]  ;;  %v510_v15 = vpop.permute.xlu0 %509  ;;  %v577_v16 = vld [vmem:[#allocation2 + $0x8] sm:$0xff] }
  0xb9   : > { %1187 = vmatprep.mubr.msk.f32.mxu1 %vm591_vm4, %v576_v14  ;;  %520 = vst.msk [vmem:[#allocation2 + $0x10] sm:$0xff] %vm517_vm3, %v510_v15  ;;  %v566_v17 = vpop.permute.xlu1 %565  ;;  %v1380_v14 = vmov 0.0   ;;  %v956_v15 = vld [vmem:[#allocation7 + $0x70] sm:$0xff] }
  0xba   : > { %1188 = vmatmul.mubr.msk.f32.vlgmr.msra.gmra.mxu1 %vm591_vm4, %v577_v16  ;;  %575 = vst.msk [vmem:[#allocation2 + $0x18] sm:$0xff] %vm571_vm2, %v566_v17  ;;  %976 = vmatprep.subr.mxu0 %v1380_v14  ;;  %v955_v16 = vld [vmem:[#allocation7 + $0x68] sm:$0xff]  ;;  %v954_v17 = vld [vmem:[#allocation7 + $0x60] sm:$0xff] }
  0xbb   : > { %1194 = vmatpush3.msra.mxu1 %v806_v27  ;;  %977 = vmatpush1.msra.mxu0 %v957_v13  ;;  %v944_v27 = vld [vmem:[#allocation7 + $0x10] sm:$0xff] }
  0xbc   : > { %v564_v18 = vpop.permute.xlu0 %563  ;;  %1195 = vmatprep.subr.mxu1 %v805_v28  ;;  %978 = vmatprep.subr.mxu0 %v1380_v14 }
  0xbd   : > { %574 = vst.msk [vmem:[#allocation2 + $0x10] sm:$0xff] %vm571_vm2, %v564_v18  ;;  %1196 = vmatpush3.msra.mxu1 %v805_v28  ;;  %979 = vmatpush1.msra.mxu0 %v956_v15  ;;  %v953_v18 = vld [vmem:[#allocation7 + $0x58] sm:$0xff]  ;;  %v943_v28 = vld [vmem:[#allocation7 + $0x8] sm:$0xff] }
  0xbe   : > { %1197 = vmatprep.subr.mxu1 %v804_v30  ;;  %980 = vmatprep.subr.mxu0 %v1380_v14 }
  0xbf   : > { %1198 = vmatpush3.msra.mxu1 %v804_v30  ;;  %981 = vmatpush1.msra.mxu0 %v955_v16  ;;  %v965_v30 = vld [vmem:[#allocation7 + $0xb8] sm:$0xff] }
  0xc0   : > { %1199 = vmatprep.subr.mxu1 %v803_v31  ;;  %982 = vmatprep.subr.mxu0 %v1380_v14 }
  0xc1   : > { %v579_v19 = vld [vmem:[#allocation2 + $0x18] sm:$0xff]  ;;  %1200 = vmatpush3.msra.mxu1 %v803_v31  ;;  %983 = vmatpush1.msra.mxu0 %v954_v17  ;;  %v964_v31 = vld [vmem:[#allocation7 + $0xb0] sm:$0xff] }
  0xc2   : > { %1201 = vmatprep.subr.mxu1 %v802_v32  ;;  %984 = vmatprep.subr.mxu0 %v1380_v14 }
  0xc3   : > { %1202 = vmatpush3.msra.mxu1 %v802_v32  ;;  %985 = vmatpush1.msra.mxu0 %v953_v18  ;;  %v963_v32 = vld [vmem:[#allocation7 + $0xa8] sm:$0xff] }
  0xc4   : > { %v578_v20 = vld [vmem:[#allocation2 + $0x10] sm:$0xff]  ;;  %1203 = vmatprep.subr.mxu1 %v801_v33  ;;  %986 = vmatprep.subr.mxu0 %v1380_v14 }
  0xc5   : > { %1190 = vmatprep.mubr.msk.f32.mxu1 %vm591_vm4, %v578_v20  ;;  %1204 = vmatpush3.msra.mxu1 %v801_v33  ;;  %v951_v20 = vld [vmem:[#allocation7 + $0x48] sm:$0xff]  ;;  %v962_v33 = vld [vmem:[#allocation7 + $0xa0] sm:$0xff] }
  0xc6   : > { %1191 = vmatmul.mubr.msk.f32.gmra.mxu1 %vm591_vm4, %v579_v19  ;;  %1205 = vmatprep.subr.mxu1 %v800_v42  ;;  %v952_v19 = vld [vmem:[#allocation7 + $0x50] sm:$0xff] }
  0xc7   : > { %1206 = vmatpush3.msra.mxu1 %v800_v42  ;;  %987 = vmatpush1.msra.mxu0 %v952_v19 }
  0xc8   : > { %1207 = vmatprep.subr.mxu1 %v799_v43  ;;  %988 = vmatprep.subr.mxu0 %v1380_v14 }
  0xc9   : > { %1208 = vmatpush3.msra.mxu1 %v799_v43  ;;  %989 = vmatpush1.msra.mxu0 %v951_v20  ;;  %v959_v43 = vld [vmem:[#allocation7 + $0x88] sm:$0xff] }
  0xca   : > { %1209 = vmatprep.subr.mxu1 %v798_v45  ;;  %990 = vmatprep.subr.mxu0 %v1380_v14 }
  0xcb   : > { %1210 = vmatpush3.msra.mxu1 %v798_v45  ;;  %v909_v45 = vand.u32 3, %v1489_v1 }
  0xcc   : > { %1211 = vmatprep.subr.mxu1 %v797_v46 }
  0xcd   : > { %1212 = vmatpush3.msra.mxu1 %v797_v46  ;;  %vm934_vm12 = vcmp.le.s32.totalorder %v909_v45, 2  ;;  %vm913_vm13 = vcmp.ge.s32.totalorder %v909_v45, 1 }
  0xce   : > { %1213 = vmatprep.subr.mxu1 %v796_v47 }
  0xcf   : > { %1214 = vmatpush3.msra.mxu1 %v796_v47 }
  0xd0   : > { %1215 = vmatprep.subr.mxu1 %v795_v50 }
  0xd1   : > { %1216 = vmatpush3.msra.mxu1 %v795_v50 }
 0x17a   : > { %v1189_v22 = vpop.f32.mrf.mxu1 }
 0x17b   : > { %v680_v23 = vadd.f32 %v1189_v22, %v1142_v21  ;;  %v949_v22 = vld [vmem:[#allocation7 + $0x38] sm:$0xff] }
 0x17c   : > { %v674_v24 = vpop.f32.mrf.mxu1 }
 0x17d   : > { %v694_v25 = vmax.f32 %v680_v23, 0.0  ;;  %v675_v26 = vadd.f32 %v1142_v21, %v674_v24  ;;  %v948_v23 = vld [vmem:[#allocation7 + $0x30] sm:$0xff]  ;;  %v947_v24 = vld [vmem:[#allocation7 + $0x28] sm:$0xff] }
 0x17f   : > { %699 = vst.msk [vmem:[#allocation3 + $0x8] sm:$0xff] %vm697_vm5, %v694_v25  ;;  %v693_v29 = vmax.f32 %v675_v26, 0.0  ;;  %v946_v25 = vld [vmem:[#allocation7 + $0x20] sm:$0xff]  ;;  %v945_v26 = vld [vmem:[#allocation7 + $0x18] sm:$0xff] }
 0x181   : > { %698 = vst.msk [vmem:[#allocation3] sm:$0xff] %vm697_vm5, %v693_v29  ;;  %v942_v29 = vld [vmem:[#allocation7] sm:$0xff] }
 0x186   : > { %v1192_v34 = vpop.f32.mrf.mxu1 }
 0x187   : > { %v690_v35 = vadd.f32 %v1192_v34, %v1142_v21  ;;  %v1148_v34 = vld [vmem:[%s1828_s5] ss:$0 sm:$0xff] }
 0x188   : > { %v702_v36 = vld [vmem:[#allocation3] ss:$2 sm:$0xff]  ;;  %v706_v37 = vld [vmem:[#allocation3 + $0x1] ss:$2 sm:$0xff]  ;;  %v684_v38 = vpop.f32.mrf.mxu1 }
 0x189   : > { %v709_v39 = vmax.f32 %v702_v36, %v706_v37  ;;  %v696_v40 = vmax.f32 %v690_v35, 0.0  ;;  %v685_v41 = vadd.f32 %v1142_v21, %v684_v38  ;;  %v950_v21 = vld [vmem:[#allocation7 + $0x40] sm:$0xff] }
 0x18a   : > { %991 = vmatpush1.msra.mxu0 %v950_v21 }
 0x18b   : > { %757 = vrot.lane.b32.xlu0 %v709_v39, %s1378_s29  ;;  %701 = vst.msk [vmem:[#allocation3 + $0x18] sm:$0xff] %vm697_vm5, %v696_v40  ;;  %v695_v44 = vmax.f32 %v685_v41, 0.0  ;;  %v725_v57 = vrot.slane %v709_v39, 7  ;;  %v766_v59 = vrot.slane %v709_v39, 1  ;;  %992 = vmatprep.subr.mxu0 %v1380_v14  ;;  %v961_v40 = vld [vmem:[#allocation7 + $0x98] sm:$0xff]  ;;  %v960_v41 = vld [vmem:[#allocation7 + $0x90] sm:$0xff] }
 0x18c   : > { %993 = vmatpush1.msra.mxu0 %v949_v22 }
 0x18d   : > { %700 = vst.msk [vmem:[#allocation3 + $0x10] sm:$0xff] %vm697_vm5, %v695_v44  ;;  %994 = vmatprep.subr.mxu0 %v1380_v14  ;;  %v958_v44 = vld [vmem:[#allocation7 + $0x80] sm:$0xff] }
 0x18e   : > { %995 = vmatpush1.msra.mxu0 %v948_v23 }
 0x18f   : > { %996 = vmatprep.subr.mxu0 %v1380_v14 }
 0x190   : > { %997 = vmatpush1.msra.mxu0 %v947_v24 }
 0x191   : > { %998 = vmatprep.subr.mxu0 %v1380_v14 }
 0x192   : > { %999 = vmatpush1.msra.mxu0 %v946_v25 }
 0x193   : > { %1000 = vmatprep.subr.mxu0 %v1380_v14 }
 0x194   : > { %v704_v51 = vld [vmem:[#allocation3 + $0x10] ss:$2 sm:$0xff]  ;;  %v708_v52 = vld [vmem:[#allocation3 + $0x11] ss:$2 sm:$0xff]  ;;  %1001 = vmatpush1.msra.mxu0 %v945_v26 }
 0x195   : > { %v710_v53 = vmax.f32 %v704_v51, %v708_v52  ;;  %1002 = vmatprep.subr.mxu0 %v1380_v14 }
 0x196   : > { %1003 = vmatpush1.msra.mxu0 %v944_v27 }
 0x197   : > { %759 = vrot.lane.b32.xlu1 %v710_v53, %s1378_s29  ;;  %v726_v58 = vrot.slane %v710_v53, 7  ;;  %v767_v60 = vrot.slane %v710_v53, 1  ;;  %1004 = vmatprep.subr.mxu0 %v1380_v14  ;;  %s1381_s29 = smov [#allocation10]  }
 0x198   : > { %1005 = vmatpush1.msra.mxu0 %v943_v28  ;;  %s1309_s8 = sshll.u32 %s1381_s29, 4  ;;  %s1310_s8 = int_to_ptr.vmem [resolvable:$false] %s1309_s8 }
 0x199   : > { %v769_v61 = vsel %vm472_vm1, %v767_v60, %v766_v59  ;;  %v727_v62 = vsel %vm373_vm0, %v725_v57, %v726_v58  ;;  %v768_v63 = vsel %vm472_vm1, %v766_v59, %v767_v60  ;;  %v728_v0 = vsel %vm373_vm0, %v726_v58, %v725_v57  ;;  %1006 = vmatprep.subr.mxu0 %v1380_v14  ;;  %s1311_s28 = scalar_lea.vmem %s1310_s8, 256  ;;  %p1312_p11 = scmp.lt.s32.totalorder %s1063_s18, %s1310_s8 }
 0x19a   : > { %v781_v3 = vsel %vm1719_vm7, %v769_v61, 0.0  ;;  %v740_v4 = vsel %vm1715_vm6, %v727_v62, 0.0  ;;  %v780_v5 = vsel %vm1727_vm9, %v768_v63, 0.0  ;;  %v739_v6 = vsel %vm1723_vm8, %v728_v0, 0.0  ;;  %1007 = vmatpush1.msra.mxu0 %v942_v29 }
 0x19b   : > { %786 = vrot.lane.b32.xlu1 %v781_v3, %s1379_s23  ;;  %742 = vst.msk [vmem:[#allocation4 + $0x8] sm:$0xff] %vm697_vm5, %v740_v4  ;;  %784 = vrot.lane.b32.xlu0 %v780_v5, %s1379_s23  ;;  %741 = vst.msk [vmem:[#allocation4] sm:$0xff] %vm697_vm5, %v739_v6  ;;  %vm763_vm0 = vcmask 523520   ;;  %vm790_vm1 = vcmask 785920  }
 0x19c   : > { %1024 = vmatprep.subr.mxu0 %v1380_v14 }
 0x19d   : > { %1025 = vmatpush2.msra.mxu0 %v965_v30 }
 0x19e   : > { %1026 = vmatprep.subr.mxu0 %v1380_v14 }
 0x19f   : > { %1027 = vmatpush2.msra.mxu0 %v964_v31 }
 0x1a0   : > { %1028 = vmatprep.subr.mxu0 %v1380_v14 }
 0x1a1   : > { %1029 = vmatpush2.msra.mxu0 %v963_v32 }
 0x1a2   : > { %1030 = vmatprep.subr.mxu0 %v1380_v14 }
 0x1a3   : > { %1031 = vmatpush2.msra.mxu0 %v962_v33 }
 0x1a4   : > { %1032 = vmatprep.subr.mxu0 %v1380_v14 }
 0x1a5   : > { %1033 = vmatpush2.msra.mxu0 %v961_v40 }
 0x1a6   : > { %1034 = vmatprep.subr.mxu0 %v1380_v14 }
 0x1a7   : > { %1035 = vmatpush2.msra.mxu0 %v960_v41 }
 0x1a8   : > { %1036 = vmatprep.subr.mxu0 %v1380_v14 }
 0x1a9   : > { %1037 = vmatpush2.msra.mxu0 %v959_v43 }
 0x1aa   : > { %1038 = vmatprep.subr.mxu0 %v1380_v14 }
 0x1ab   : > { %1039 = vmatpush2.msra.mxu0 %v958_v44 }
 0x1fd   : > { %v758_v7 = vpop.permute.xlu0 %757 }
 0x1fe   : > { %764 = vst.msk [vmem:[#allocation4] sm:$0xff] %vm763_vm0, %v758_v7 }
 0x209   : > { %v760_v8 = vpop.permute.xlu1 %759 }
 0x20a   : > { %765 = vst.msk [vmem:[#allocation4 + $0x8] sm:$0xff] %vm763_vm0, %v760_v8 }
 0x20d   : > { %v787_v9 = vpop.permute.xlu1 %786  ;;  %v785_v10 = vpop.permute.xlu0 %784 }
 0x20e   : > { %792 = vst.msk [vmem:[#allocation4 + $0x8] sm:$0xff] %vm790_vm1, %v787_v9  ;;  %791 = vst.msk [vmem:[#allocation4] sm:$0xff] %vm790_vm1, %v785_v10 }
 0x215   : > { %v793_v11 = vld [vmem:[#allocation4] sm:$0xff]  ;;  %v794_v12 = vld [vmem:[#allocation4 + $0x8] sm:$0xff] }
 0x216   : > { %1217 = vmatprep.mubr.msk.f32.mxu1 %vm814_vm10, %v793_v11 }
 0x217   : > { %1218 = vmatmul.mubr.msk.f32.vlgmr.msra.gmra.mxu1 %vm814_vm10, %v794_v12 }
 0x2d7   : > { %v1219_v35 = vpop.f32.mrf.mxu1 }
 0x2d8   : > { %v893_v36 = vadd.f32 %v1219_v35, %v1148_v34 }
 0x2d9   : > { %v887_v37 = vpop.f32.mrf.mxu1 }
 0x2da   : > { %v897_v38 = vmax.f32 %v893_v36, 0.0  ;;  %v888_v39 = vadd.f32 %v1148_v34, %v887_v37 }
 0x2dc   : > { %900 = vst.msk [vmem:[#allocation5 + $0x8] sm:$0xff] %vm898_vm11, %v897_v38  ;;  %v896_v42 = vmax.f32 %v888_v39, 0.0 }
 0x2de   : > { %899 = vst.msk [vmem:[#allocation5] sm:$0xff] %vm898_vm11, %v896_v42 }
 0x2e5   : > { %v901_v46 = vld [vmem:[#allocation5] ss:$2 sm:$0xff]  ;;  %v903_v47 = vld [vmem:[#allocation5 + $0x1] ss:$2 sm:$0xff] }
 0x2e6   : > { %v904_v48 = vmax.f32 %v901_v46, %v903_v47 }
 0x2e8   : > { %927 = vrot.lane.b32.xlu0 %v904_v48, %s1379_s23  ;;  %v912_v49 = vrot.slane %v904_v48, 7  ;;  %v932_v50 = vrot.slane %v904_v48, 1  ;;  %s1305_s23 = scalar_lea.vmem %s1063_s18, 128 }
 0x2e9   : > { %p1306_p8 = scmp.ne.s32.totalorder %s1063_s18, %s1305_s23  ;;  %p1313_p12 = scmp.lt.s32.totalorder %s1311_s28, %s1305_s23 }
 0x2ea   : > { %v938_v51 = vsel %vm934_vm12, %v932_v50, 0.0  ;;  %v918_v52 = vsel %vm913_vm13, %v912_v49, 0.0 }
 0x2eb   : > { %939 = vst.msk [vmem:[#allocation6 + $0x8] sm:$0xff] %vm898_vm11, %v938_v51  ;;  %919 = vst.msk [vmem:[#allocation6] sm:$0xff] %vm898_vm11, %v918_v52  ;;  %p1307_p9 = pnand %p1306_p8, %p1460_p5  ;;  %p1314_p13 = por %p1313_p12, %p1312_p11 }
 0x2ed   : > { %p1308_p10 = pneg %p1307_p9 }
 0x2ef   : > { %p1315_p0 = pnand %p1314_p13, %p1308_p10 }
 0x2f2   : > { %v941_v53 = vld [vmem:[#allocation6 + $0x8] sm:$0xff] }
 0x2f3   : > { %1152 = vmatprep.mubr.msk.f32.mxu0 %vm898_vm11, %v941_v53 }
 0x35a   : > { %v928_v1 = vpop.permute.xlu0 %927 }
 0x35b   : > { %931 = vst.msk [vmem:[#allocation6] sm:$0xff] %vm930_vm14, %v928_v1 }
 0x362   : > { %v940_v54 = vld [vmem:[#allocation6] sm:$0xff] }
 0x363   : > { %1041 = vmatmul.mubr.f32.vlgmr.msra.gmra.mxu0 %v940_v54 }
 0x423   : > { %v1042_v2 = vpop.f32.mrf.mxu0 }
 0x424   : > { %v1043_v56 = vadd.f32 %v1151_v55, %v1042_v2 }
 0x425   : > { %v1044_v57 = vpop.f32.mrf.mxu0 }
 0x426   : > { %v1046_v58 = vmax.f32 %v1043_v56, 0.0 }
 0x428   : > { %1047 = vst [vmem:[%s287_s17] sm:$0xff] %v1046_v58 }
 0x429   : > { %1318 = shalt.err (!%p1315_p0)
}
 0x42a   : > { %s1319_s13 = scalar_lea.hbm %s1060_s21, 128  ;;  %s1323_s15 = scalar_lea.hbm %s1830_s7, 256 }
 0x42b   : > { %p1320_p1 = scmp.ne.s32.totalorder %s1060_s21, %s1319_s13  ;;  %p1324_p4 = scmp.lt.s32.totalorder %s1060_s21, %s1830_s7 }
 0x42c   : > { %p1325_p7 = scmp.lt.s32.totalorder %s1323_s15, %s1319_s13 }
 0x42d   : > { %p1321_p2 = pnand %p1320_p1, %p1460_p5 }
 0x42e   : > { %p1326_p6 = por %p1325_p7, %p1324_p4 }
 0x42f   : > { %p1322_p3 = pneg %p1321_p2 }
 0x431   : > { %p1327_p8 = pnand %p1326_p6, %p1322_p3 }
 0x433   : > { %1330 = shalt.err (!%p1327_p8)
}
 0x434   : > { %1224 = dma.vmem_to_hbm [thread:$0]  (%p1460_p5), %s1063_s18, 128, %s1060_s21, %s1049_s22  }
 0x435 PF: > { %p1236_p9 = scmp.ge.s32.totalorder %s1369_s27, 2  ;;  %s1074_s19 = sand.u32 1, %s1357_s24  }
 0x436   : > { %p1854_p10 = scmp.ne.s32.totalorder %s1832_s12, 0  ;;  %s1075_s20 = scalar_lea.sflag [#allocation9], %s1074_s19 }
 0x438   : > { %p1231_p11 = pnand %p1236_p9, %p1854_p10 }
 0x43a   : > { %p1232_p12 = pneg %p1231_p11 }
 0x43c   : > { %1352 = dma.done.wait (%p1232_p12), %s1075_s20, 128  }
 0x43d   : > { %1354 = vsyncadd (%p1232_p12), %s1075_s20, 4294967168  ;;  %p18_p13 = scmp.ge.s32.totalorder %s1447_s30, 4   ;;  %s1855_s24 = smov %s1361_s25 }
 0x43e   : > { %s1856_s25 = smov %s1365_s26  ;;  %s1857_s26 = smov %s1458_s10 }
 0x43f   : > { %s1858_s27 = smov %s1447_s30  ;;  %20 = sbr.rel (!%p18_p13) target bundleno = 4 (0x4), region = 92 }
 0x444   :  { %1080 = vsyncpa [#allocation8], 1 }
 0x445   :  { %1082 = vsyncpa [#allocation8 + $0x1], 1 }
 0x446   :  { %1083 = vsyncpa [#allocation9], 1 }
 0x447   :  { %1085 = vsyncpa [#allocation9 + $0x1], 1 }

</bundles_post_ra>
